<compile_context>
chip_gen: v7x
topology: tpu7x:2x2x1
jax: 0.10.0
libtpu: 0.0.40
codegen_flags: <defaults>
</compile_context>

<pallas_src>
import jax
import jax.numpy as jnp
from jax.experimental import pallas as pl
from jax.experimental.pallas import tpu as pltpu


def _round_up(x: int, m: int) -> int:
    return ((x + m - 1) // m) * m


def _mlp_kernel(x_ref, w1_ref, b1_ref, w2_ref, b2_ref, o_ref):
    # x_ref:  (TILE_M, 2)   w1_ref: (2, H)   b1_ref: (1, H)
    # w2_ref: (H, T)        b2_ref: (1, T)   o_ref:  (TILE_M, T)

    # ---- Layer 1: Linear(2 -> H) + ReLU, on the VPU ----------------------
    # K=2 is far too shallow for the MXU (2/256 contraction depth), so do two
    # broadcast FMAs instead and keep the MXU free for the H->T matmul.
    x = x_ref[...]
    w1 = w1_ref[...].astype(jnp.float32)
    x0 = x[:, 0:1].astype(jnp.float32)                 # (TILE_M, 1)
    x1 = x[:, 1:2].astype(jnp.float32)                 # (TILE_M, 1)
    h = x0 * w1[0:1, :] + x1 * w1[1:2, :] + b1_ref[...].astype(jnp.float32)
    h = jnp.maximum(h, 0.0)                            # (TILE_M, H) f32

    # ---- Layer 2: Linear(H -> T), on the MXU -----------------------------
    # Operands in the weight dtype (bf16 fast path when params are bf16),
    # accumulation in f32.
    o = jnp.dot(h.astype(w2_ref.dtype), w2_ref[...],
                preferred_element_type=jnp.float32)
    o = o + b2_ref[...].astype(jnp.float32)

    # Single store to the output block (v5e has only one vst slot/bundle).
    o_ref[...] = o.astype(o_ref.dtype)


def waypoint_input_adaptor(x, w1, b1, w2, b2, *, tile_m: int = 2048):
    """x: [B, N, 2] -> [B, N, token_size].  Pure-Pallas hot path.

    Weights are stored as [in_features, out_features] (transpose of
    torch.nn.Linear.weight).
    """
    B, N, Fin = x.shape
    assert Fin == 2, "WaypointInputAdaptor expects last dim == 2"
    H = w1.shape[1]
    T = w2.shape[1]
    M = B * N

    x2d = x.reshape(M, Fin)
    b1_2d = b1.reshape(1, H)
    b2_2d = b2.reshape(1, T)

    # Row tiling: pick a tile <= tile_m, sublane-aligned, and pad M so the
    # grid divides evenly (padded rows are sliced off afterwards).
    tile = min(tile_m, _round_up(M, 8))
    m_pad = _round_up(M, tile)
    if m_pad != M:
        x2d = jnp.pad(x2d, ((0, m_pad - M), (0, 0)))
    grid = (m_pad // tile,)

    # Advisory cost estimate for XLA's scheduler around the custom call.
    flops = 2 * m_pad * H * T + 4 * m_pad * H
    bytes_accessed = (
        x2d.dtype.itemsize * m_pad * Fin
        + w1.dtype.itemsize * Fin * H + b1.dtype.itemsize * H
        + w2.dtype.itemsize * H * T + b2.dtype.itemsize * T
        + x.dtype.itemsize * m_pad * T
    )

    out2d = pl.pallas_call(
        _mlp_kernel,
        out_shape=jax.ShapeDtypeStruct((m_pad, T), x.dtype),
        grid=grid,
        in_specs=[
            pl.BlockSpec((tile, Fin), lambda i: (i, 0)),   # x rows: tiled
            pl.BlockSpec((Fin, H), lambda i: (0, 0)),      # w1: resident
            pl.BlockSpec((1, H), lambda i: (0, 0)),        # b1: resident
            pl.BlockSpec((H, T), lambda i: (0, 0)),        # w2: resident
            pl.BlockSpec((1, T), lambda i: (0, 0)),        # b2: resident
        ],
        out_specs=pl.BlockSpec((tile, T), lambda i: (i, 0)),
        compiler_params=pltpu.CompilerParams(
            dimension_semantics=("parallel",),
        ),
        cost_estimate=pl.CostEstimate(
            flops=flops, transcendentals=0, bytes_accessed=bytes_accessed),
    )(x2d, w1, b1_2d, w2, b2_2d)

    if m_pad != M:
        out2d = out2d[:M]
    return out2d.reshape(B, N, T)


def _reference(x, w1, b1, w2, b2):
    h = jnp.maximum(jnp.einsum("bnf,fh->bnh", x, w1) + b1, 0.0)
    return jnp.einsum("bnh,ht->bnt", h, w2) + b2


if __name__ == "__main__":
    # Small shapes consistent with the module: [B, N, 2] -> [B, N, token_size]
    B, N = 2, 8
    hidden_size = 64
    token_size = 258  # module default

    key = jax.random.PRNGKey(0)
    kx, k1, k2, k3, k4 = jax.random.split(key, 5)

    x = jax.random.normal(kx, (B, N, 2), dtype=jnp.float32)

    # Deterministic synthetic parameters (shapes from nn.Linear(2,H), nn.Linear(H,T)).
    # Stored as [in, out] (transpose of torch layout).
    w1 = jax.random.normal(k1, (2, hidden_size), dtype=jnp.float32) * 0.5
    b1 = jax.random.normal(k2, (hidden_size,), dtype=jnp.float32) * 0.1
    w2 = jax.random.normal(k3, (hidden_size, token_size), dtype=jnp.float32) * 0.1
    b2 = jax.random.normal(k4, (token_size,), dtype=jnp.float32) * 0.1

    out = waypoint_input_adaptor(x, w1, b1, w2, b2)
    out = jax.block_until_ready(out)

    ref = _reference(x, w1, b1, w2, b2)
    assert out.shape == (B, N, token_size), out.shape
    assert jnp.allclose(out, ref, atol=1e-4, rtol=1e-4), "mismatch vs reference"

    print("KERNEL_OK")
</pallas_src>

<mosaic_0001>
module attributes {stable_mosaic.version = 11 : i64} {
  func.func @_mlp_kernel(%arg0: i32, %arg1: memref<16x2xf32, #tpu.memory_space<vmem>>, %arg2: memref<2x64xf32, #tpu.memory_space<vmem>>, %arg3: memref<1x64xf32, #tpu.memory_space<vmem>>, %arg4: memref<64x258xf32, #tpu.memory_space<vmem>>, %arg5: memref<1x258xf32, #tpu.memory_space<vmem>>, %arg6: memref<16x258xf32, #tpu.memory_space<vmem>>) attributes {dimension_semantics = [#tpu.dimension_semantics<parallel>], iteration_bounds = array<i64: 1>, scalar_prefetch = 0 : i64, scratch_operands = 0 : i64, tpu.core_type = #tpu.core_type<tc>, window_params = [{transform_indices = @transform_0, window_bounds = array<i64: 16, 2>}, {pipeline_mode = #tpu.pipeline_mode<synchronous>, transform_indices = @transform_1, window_bounds = array<i64: 2, 64>}, {pipeline_mode = #tpu.pipeline_mode<synchronous>, transform_indices = @transform_2, window_bounds = array<i64: 1, 64>}, {pipeline_mode = #tpu.pipeline_mode<synchronous>, transform_indices = @transform_3, window_bounds = array<i64: 64, 258>}, {pipeline_mode = #tpu.pipeline_mode<synchronous>, transform_indices = @transform_4, window_bounds = array<i64: 1, 258>}, {transform_indices = @transform_5, window_bounds = array<i64: 16, 258>}]} {
    %c0 = arith.constant 0 : index
    %c0_0 = arith.constant 0 : index
    %0 = vector.load %arg1[%c0, %c0_0] : memref<16x2xf32, #tpu.memory_space<vmem>>, vector<16x2xf32>
    %c0_1 = arith.constant 0 : index
    %c0_2 = arith.constant 0 : index
    %1 = vector.load %arg2[%c0_1, %c0_2] : memref<2x64xf32, #tpu.memory_space<vmem>>, vector<2x64xf32>
    %2 = vector.extract_strided_slice %0 {offsets = [0, 0], sizes = [16, 1], strides = [1, 1]} : vector<16x2xf32> to vector<16x1xf32>
    %3 = vector.extract_strided_slice %0 {offsets = [0, 1], sizes = [16, 1], strides = [1, 1]} : vector<16x2xf32> to vector<16x1xf32>
    %4 = vector.extract_strided_slice %1 {offsets = [0, 0], sizes = [1, 64], strides = [1, 1]} : vector<2x64xf32> to vector<1x64xf32>
    %5 = vector.broadcast %2 : vector<16x1xf32> to vector<16x64xf32>
    %6 = vector.broadcast %4 : vector<1x64xf32> to vector<16x64xf32>
    %7 = arith.mulf %5, %6 : vector<16x64xf32>
    %8 = vector.extract_strided_slice %1 {offsets = [1, 0], sizes = [1, 64], strides = [1, 1]} : vector<2x64xf32> to vector<1x64xf32>
    %9 = vector.broadcast %3 : vector<16x1xf32> to vector<16x64xf32>
    %10 = vector.broadcast %8 : vector<1x64xf32> to vector<16x64xf32>
    %11 = arith.mulf %9, %10 : vector<16x64xf32>
    %12 = arith.addf %7, %11 : vector<16x64xf32>
    %c0_3 = arith.constant 0 : index
    %c0_4 = arith.constant 0 : index
    %13 = vector.load %arg3[%c0_3, %c0_4] : memref<1x64xf32, #tpu.memory_space<vmem>>, vector<1x64xf32>
    %14 = vector.broadcast %13 : vector<1x64xf32> to vector<16x64xf32>
    %15 = arith.addf %12, %14 : vector<16x64xf32>
    %cst = arith.constant 0.000000e+00 : f32
    %16 = vector.broadcast %cst : f32 to vector<16x64xf32>
    %17 = arith.maximumf %15, %16 : vector<16x64xf32>
    %c0_5 = arith.constant 0 : index
    %c0_6 = arith.constant 0 : index
    %18 = vector.load %arg4[%c0_5, %c0_6] : memref<64x258xf32, #tpu.memory_space<vmem>>, vector<64x258xf32>
    %cst_7 = arith.constant dense<0.000000e+00> : vector<16x258xf32>
    %19 = tpu.matmul %17, %18, %cst_7 {dimension_numbers = #tpu.dot_dimension_numbers<[1], [0], [0], [1], [0, 0, 1, 1], [], []>} : vector<16x64xf32>, vector<64x258xf32>, vector<16x258xf32> -> vector<16x258xf32>
    %c0_8 = arith.constant 0 : index
    %c0_9 = arith.constant 0 : index
    %20 = vector.load %arg5[%c0_8, %c0_9] : memref<1x258xf32, #tpu.memory_space<vmem>>, vector<1x258xf32>
    %21 = vector.broadcast %20 : vector<1x258xf32> to vector<16x258xf32>
    %22 = arith.addf %19, %21 : vector<16x258xf32>
    %c0_10 = arith.constant 0 : index
    %c0_11 = arith.constant 0 : index
    %23 = vector.load %arg6[%c0_10, %c0_11] : memref<16x258xf32, #tpu.memory_space<vmem>>, vector<16x258xf32>
    tpu.vector_store %arg6[%c0_10, %c0_11], %22 {strides = array<i32>} : memref<16x258xf32, #tpu.memory_space<vmem>>, vector<16x258xf32>,
    return
  }
  func.func @transform_0(%arg0: i32) -> (i32, i32) {
    %c0_i32 = arith.constant 0 : i32
    %c0_i32_0 = arith.constant 0 : i32
    return %arg0, %c0_i32 : i32, i32
  }
  func.func @transform_1(%arg0: i32) -> (i32, i32) {
    %c0_i32 = arith.constant 0 : i32
    %c0_i32_0 = arith.constant 0 : i32
    %c0_i32_1 = arith.constant 0 : i32
    return %c0_i32, %c0_i32_0 : i32, i32
  }
  func.func @transform_2(%arg0: i32) -> (i32, i32) {
    %c0_i32 = arith.constant 0 : i32
    %c0_i32_0 = arith.constant 0 : i32
    %c0_i32_1 = arith.constant 0 : i32
    return %c0_i32, %c0_i32_0 : i32, i32
  }
  func.func @transform_3(%arg0: i32) -> (i32, i32) {
    %c0_i32 = arith.constant 0 : i32
    %c0_i32_0 = arith.constant 0 : i32
    %c0_i32_1 = arith.constant 0 : i32
    return %c0_i32, %c0_i32_0 : i32, i32
  }
  func.func @transform_4(%arg0: i32) -> (i32, i32) {
    %c0_i32 = arith.constant 0 : i32
    %c0_i32_0 = arith.constant 0 : i32
    %c0_i32_1 = arith.constant 0 : i32
    return %c0_i32, %c0_i32_0 : i32, i32
  }
  func.func @transform_5(%arg0: i32) -> (i32, i32) {
    %c0_i32 = arith.constant 0 : i32
    %c0_i32_0 = arith.constant 0 : i32
    return %arg0, %c0_i32 : i32, i32
  }
}

</mosaic_0001>

<bundles_post_ra>
// kernel: tpu_custom_call.1
= control target key start
LH: loop header
LB: loop body
LE: loop exit
PB: predicated region body
PF: predicated region fallthrough
CT: control target
= control target key end

     0   :  { %10 = vsyncpa [#allocation3], 0  ;;  %s512_s0 = inlined_call_operand.vmem [shape: f32[16,2], index: 0, kind: input, shape index: {}]   ;;  %s513_s1 = inlined_call_operand.vmem [shape: f32[2,64], index: 1, kind: input, shape index: {}]   ;;  %s514_s2 = inlined_call_operand.vmem [shape: f32[1,64], index: 2, kind: input, shape index: {}]   ;;  %s515_s3 = inlined_call_operand.hbm [shape: f32[64,258], index: 3, kind: input, shape index: {}]   ;;  %s516_s4 = inlined_call_operand.vmem [shape: f32[1,258], index: 4, kind: input, shape index: {}]   ;;  %s517_s5 = inlined_call_operand.hbm [shape: f32[16,258], index: 5, kind: output, shape index: {}]  }
   0x1   :  { %11 = vsyncpa [#allocation4], 0  ;;  %s430_s18 = smov [#allocation2]   ;;  %s382_s22 = scalar_lea.hbm %s515_s3, 3072 }
   0x2   :  { %s23_s19 = sshll.u32 %s430_s18, 4  ;;  %p383_p0 = scmp.ne.s32.totalorder %s515_s3, %s382_s22  ;;  %s24_s19 = int_to_ptr.vmem [resolvable:$true] %s23_s19 }
   0x3   :  { %p386_p1 = scmp.lt.u32.totalorder %s382_s22, %s515_s3 }
   0x5   :  { %p388_p2 = pnand %p386_p1, %p383_p0 }
   0x7   :  { %391 = shalt.err (!%p388_p2)
}
   0x8   :  { %s392_s27 = scalar_lea.vmem %s24_s19, 3072  ;;  %p397_p4 = scmp.lt.s32.totalorder %s24_s19, %s24_s19 }
   0x9   :  { %p393_p3 = scmp.ne.s32.totalorder %s24_s19, %s392_s27  ;;  %p398_p5 = scmp.lt.s32.totalorder %s392_s27, %s392_s27 }
   0xb   :  { %p399_p6 = por %p398_p5, %p397_p4 }
   0xd   :  { %p400_p7 = pnand %p399_p6, %p393_p3 }
   0xf   :  { %403 = shalt.err (!%p400_p7)
}
  0x10   :  { %s431_s28 = smov 384   ;;  %s432_s29 = smov 24  }
  0x11   :  { %29 = dma.hbm_to_vmem [thread:$0]  %s515_s3, 3072, %s24_s19, [#allocation3], %s431_s28, %s431_s28, %s432_s29  }
  0x12   :  { %426 = dma.done.wait [#allocation3], 3072  }
  0x13   :  { %427 = vsyncadd [#allocation3], 4294964224  ;;  %v433_v0 = vmov 0   ;;  %v36_v1 = vld [vmem:[%s512_s0 + $0x8] sm:$0xff]  ;;  %v35_v2 = vld [vmem:[%s512_s0] sm:$0xff]  ;;  %v434_v19 = vmov 1   ;;  %v48_v41 = vlaneseq }
  0x14   :  { %380 = vset.pattern.permute.xlu1 %v433_v0  ;;  %378 = vset.pattern.permute.xlu0 %v433_v0  ;;  %v82_v3 = vld [vmem:[#allocation2 + $0x8] sm:$0xff]  ;;  %v85_v4 = vld [vmem:[#allocation2 + $0x20] sm:$0xff]  ;;  %v84_v6 = vld [vmem:[#allocation2 + $0x18] sm:$0xff]  ;;  %v435_v39 = vmov 0.0   ;;  %vm122_vm0 = vcmask 523264   ;;  %vm283_vm1 = vcmask 15360  }
  0x15   :  { %45 = vperm.xlu1 %380, %v36_v1   ;;  %40 = vperm.xlu0 %378, %v35_v2   ;;  %v81_v5 = vld [vmem:[#allocation2] sm:$0xff]  ;;  %v339_v7 = vpack.c.bf16 %v85_v4, %v82_v3  ;;  %v83_v8 = vld [vmem:[#allocation2 + $0x10] sm:$0xff]  ;;  %v86_v9 = vld [vmem:[#allocation2 + $0x28] sm:$0xff]  ;;  %v49_v42 = vshrl.u32 %v48_v41, 7 }
  0x16   :  { %v341_v10 = vpack.c.bf16 %v84_v6, %v81_v5  ;;  %v355_v11 = vpack.c.bf16 %v86_v9, %v83_v8  ;;  %v88_v12 = vld [vmem:[#allocation2 + $0x38] sm:$0xff]  ;;  %v91_v13 = vld [vmem:[#allocation2 + $0x50] sm:$0xff]  ;;  %v90_v16 = vld [vmem:[#allocation2 + $0x48] sm:$0xff]  ;;  %193 = vmatprep.mubr.f32.mxu0 %v435_v39 }
  0x17   :  { %v87_v14 = vld [vmem:[#allocation2 + $0x30] sm:$0xff]  ;;  %340 = vmatprep.subr.bf16.mxu0 %v339_v7  ;;  %v343_v15 = vpack.c.bf16 %v91_v13, %v88_v12  ;;  %v89_v17 = vld [vmem:[#allocation2 + $0x40] sm:$0xff]  ;;  %v92_v18 = vld [vmem:[#allocation2 + $0x58] sm:$0xff]  ;;  %v50_v43 = vsub.s32 0, %v49_v42  ;;  %v64_v44 = vsub.s32 1, %v49_v42  ;;  %v117_v0 = vsub.s32 2, %v49_v42 }
  0x18   :  { %v359_v20 = vpack.c.bf16 %v92_v18, %v89_v17  ;;  %v94_v21 = vld [vmem:[#allocation2 + $0x68] sm:$0xff]  ;;  %v97_v22 = vld [vmem:[#allocation2 + $0x80] sm:$0xff]  ;;  %v95_v23 = vld [vmem:[#allocation2 + $0x70] sm:$0xff]  ;;  %342 = vmatpush1.bf16.msra.mxu0 %v341_v10  ;;  %356 = vmatprep.subr.bf16.mxu1 %v355_v11  ;;  %v345_v24 = vpack.c.bf16 %v90_v16, %v87_v14 }
  0x19   :  { %381 = vset.pattern.permute.xlu1 %v434_v19  ;;  %379 = vset.pattern.permute.xlu0 %v434_v19  ;;  %v98_v25 = vld [vmem:[#allocation2 + $0x88] sm:$0xff]  ;;  %v347_v26 = vpack.c.bf16 %v97_v22, %v94_v21  ;;  %v93_v27 = vld [vmem:[#allocation2 + $0x60] sm:$0xff]  ;;  %v96_v28 = vld [vmem:[#allocation2 + $0x78] sm:$0xff] }
  0x1a   :  { %59 = vperm.xlu1 %381, %v36_v1   ;;  %55 = vperm.xlu0 %379, %v35_v2   ;;  %v363_v29 = vpack.c.bf16 %v98_v25, %v95_v23  ;;  %v100_v30 = vld [vmem:[#allocation2 + $0x98] sm:$0xff]  ;;  %v103_v31 = vld [vmem:[#allocation2 + $0xb0] sm:$0xff]  ;;  %v101_v32 = vld [vmem:[#allocation2 + $0xa0] sm:$0xff]  ;;  %v349_v34 = vpack.c.bf16 %v96_v28, %v93_v27 }
  0x1b   :  { %358 = vmatpush3.bf16.msra.mxu1 %v355_v11  ;;  %344 = vmatprep.subr.bf16.mxu0 %v343_v15  ;;  %v104_v33 = vld [vmem:[#allocation2 + $0xb8] sm:$0xff]  ;;  %v351_v35 = vpack.c.bf16 %v103_v31, %v100_v30  ;;  %v99_v36 = vld [vmem:[#allocation2 + $0x90] sm:$0xff]  ;;  %v102_v37 = vld [vmem:[#allocation2 + $0xa8] sm:$0xff] }
  0x1c   :  { %360 = vmatprep.subr.bf16.mxu1 %v359_v20  ;;  %346 = vmatpush1.bf16.msra.mxu0 %v345_v24  ;;  %v367_v38 = vpack.c.bf16 %v104_v33, %v101_v32  ;;  %v353_v40 = vpack.c.bf16 %v102_v37, %v99_v36  ;;  %v37_v45 = vld [vmem:[%s513_s1] sm:$0x3] }
  0x1d   :  { %348 = vmatprep.subr.bf16.mxu0 %v347_v26  ;;  %v51_v48 = vrot.slane %v37_v45, %v50_v43  ;;  %v65_v49 = vrot.slane %v37_v45, %v64_v44  ;;  %v305_v56 = vld [vmem:[%s514_s2] ss:$0 sm:$0xff]  ;;  %s436_s2 = smov [#allocation5]  }
  0x1e   :  { %v105_v63 = vld [vmem:[%s516_s4] sm:$0x7]  ;;  %s293_s14 = sshll.u32 %s436_s2, 4  ;;  %s294_s14 = int_to_ptr.vmem [resolvable:$true] %s293_s14 }
  0x1f   :  { %362 = vmatpush3.bf16.msra.mxu1 %v359_v20  ;;  %v110_v1 = vrot.slane %v105_v63, %v50_v43  ;;  %v114_v2 = vrot.slane %v105_v63, %v64_v44  ;;  %v118_v3 = vrot.slane %v105_v63, %v117_v0  ;;  %s404_s4 = scalar_lea.vmem %s294_s14, 768  ;;  %p409_p9 = scmp.lt.s32.totalorder %s294_s14, %s294_s14 }
  0x20   :  { %364 = vmatprep.subr.bf16.mxu1 %v363_v29  ;;  %350 = vmatpush1.bf16.msra.mxu0 %v349_v34  ;;  %p405_p8 = scmp.ne.s32.totalorder %s294_s14, %s404_s4  ;;  %p410_p10 = scmp.lt.s32.totalorder %s404_s4, %s404_s4 }
  0x21   :  { %352 = vmatprep.subr.bf16.mxu0 %v351_v35 }
  0x22   :  { %p411_p11 = por %p410_p10, %p409_p9 }
  0x23   :  { %366 = vmatpush3.bf16.msra.mxu1 %v363_v29 }
  0x24   :  { %368 = vmatprep.subr.bf16.mxu1 %v367_v38  ;;  %354 = vmatpush1.bf16.msra.mxu0 %v353_v40  ;;  %p412_p12 = pnand %p411_p11, %p405_p8 }
  0x27   :  { %370 = vmatpush3.bf16.msra.mxu1 %v367_v38 }
  0x94   :  { %v41_v46 = vpop.permute.xlu0 %40  ;;  %v46_v47 = vpop.permute.xlu1 %45 }
  0x95   :  { %v53_v50 = vmul.f32 %v51_v48, %v46_v47  ;;  %v52_v53 = vmul.f32 %v51_v48, %v41_v46 }
  0x99   :  { %v60_v51 = vpop.permute.xlu1 %59  ;;  %v56_v52 = vpop.permute.xlu0 %55 }
  0x9a   :  { %v67_v54 = vmul.f32 %v65_v49, %v60_v51  ;;  %v66_v55 = vmul.f32 %v65_v49, %v56_v52 }
  0x9c   :  { %v69_v57 = vadd.f32 %v67_v54, %v53_v50  ;;  %v68_v58 = vadd.f32 %v66_v55, %v52_v53 }
  0x9e   :  { %v78_v59 = vadd.f32 %v305_v56, %v69_v57  ;;  %v77_v60 = vadd.f32 %v305_v56, %v68_v58 }
  0xa0   :  { %v80_v61 = vmax.f32 %v78_v59, 0.0  ;;  %v79_v62 = vmax.f32 %v77_v60, 0.0 }
  0xa2   :  { %306 = vmatmul.mubr.msk.f32.vlgmr.msra.gmra.mrb[0].mxu0 %vm122_vm0, %v79_v62  ;;  %336 = vmatprep.mubr.msk.f32.mxu1 %vm122_vm0, %v79_v62 }
  0xa3   :  { %337 = vmatmul.mubr.msk.f32.vlgmr.msra.gmra.mrb[0].mxu1 %vm122_vm0, %v80_v61  ;;  %199 = vmatprep.mubr.f32.mxu0 %v435_v39 }
  0xa6   :  { %307 = vmatmul.mubr.msk.f32.gmra.mrb[2].mxu0 %vm122_vm0, %v80_v61 }
 0x175   :  { %v195_v4 = vpop.f32.mrb[0].mxu0 }
 0x176   :  { %v196_v5 = vadd.f32 %v195_v4, %v110_v1  ;;  %v197_v6 = vpop.f32.mrb[1].mxu0  ;;  %v338_v7 = vpop.f32.mrb[0].mxu1 }
 0x177   :  { %v198_v8 = vadd.f32 %v197_v6, %v114_v2  ;;  %v278_v9 = vadd.f32 %v338_v7, %v118_v3  ;;  %v272_v10 = vpop.f32.mrb[1].mxu1 }
 0x178   :  { %281 = vst [vmem:[#allocation5] sm:$0xff] %v196_v5  ;;  %v273_v11 = vadd.f32 %v272_v10, %v118_v3 }
 0x179   :  { %282 = vst [vmem:[#allocation5 + $0x8] sm:$0xff] %v198_v8  ;;  %287 = vst.msk [vmem:[#allocation5 + $0x28] sm:$0xff] %vm283_vm1, %v278_v9  ;;  %v201_v12 = vpop.f32.mrb[2].mxu0 }
 0x17a   :  { %284 = vst.msk [vmem:[#allocation5 + $0x10] sm:$0xff] %vm283_vm1, %v273_v11  ;;  %v202_v13 = vadd.f32 %v201_v12, %v110_v1  ;;  %v203_v14 = vpop.f32.mrb[3].mxu0 }
 0x17b   :  { %v204_v15 = vadd.f32 %v203_v14, %v114_v2 }
 0x17c   :  { %285 = vst [vmem:[#allocation5 + $0x18] sm:$0xff] %v202_v13 }
 0x17d   :  { %286 = vst [vmem:[#allocation5 + $0x20] sm:$0xff] %v204_v15 }
 0x17e   :  { %415 = shalt.err (!%p412_p12)
}
 0x17f   :  { %s416_s17 = scalar_lea.hbm %s517_s5, 768 }
 0x180   :  { %p417_p13 = scmp.ne.s32.totalorder %s517_s5, %s416_s17  ;;  %p420_p0 = scmp.lt.u32.totalorder %s416_s17, %s517_s5 }
 0x182   :  { %p422_p1 = pnand %p420_p0, %p417_p13 }
 0x184   :  { %425 = shalt.err (!%p422_p1)
}
 0x185   :  { %299 = dma.vmem_to_hbm [thread:$0]  %s294_s14, 768, %s517_s5, [#allocation4], %s431_s28, %s431_s28, %s432_s29  }
 0x186   :  { %428 = dma.done.wait [#allocation4], 768  }
 0x187   :  { %429 = vsyncadd [#allocation4], 4294966528 }
 0x188   :  { %303 = vsyncpa [#allocation3], 1 }
 0x189   :  { %304 = vsyncpa [#allocation4], 1 }

</bundles_post_ra>
